<compile_context>
chip_gen: v5e
topology: v5e:2x2
jax: 0.10.0
libtpu: 0.0.40
codegen_flags: <defaults>
</compile_context>

<pallas_src>
import functools

import jax
import jax.numpy as jnp
from jax.experimental import pallas as pl
from jax.experimental.pallas import tpu as pltpu

LANES = 128                    # vreg lane width (last dim of every block)
TM_MAX = 2048                  # max rows per block -> 1 MiB f32 / input / block
VMEM_LIMIT_BYTES = 32 * 1024 * 1024


def _cdiv(a, b):
    return -(-a // b)


def _round_up(x, m):
    return _cdiv(x, m) * m


def _num_tensorcores():
    """Best-effort TensorCores-per-chip (2 on v7x, 1 on v5e/v6e); default 1."""
    try:
        info = pltpu.get_tpu_info()
        for name in ("num_cores", "core_count", "num_tensorcores",
                     "tensor_core_count", "cores_per_chip"):
            v = getattr(info, name, None)
            if isinstance(v, int) and v >= 1:
                return max(1, min(2, v))
    except Exception:
        pass
    return 1


def _bce_blur_kernel(pred_ref, true_ref, out_ref, *,
                     inv_alpha, tm, mask_tail, n_valid_last):
    """One (tm, 128) tile of fused BCE-with-logits * alpha_factor.

    out_ref is the (8, 128) per-core accumulator (resident across the inner
    'arbitrary' grid axis); each step adds a tree-reduced partial into it.
    """
    c = pl.program_id(0)   # core ("parallel") axis
    i = pl.program_id(1)   # reduction ("arbitrary") axis

    @pl.when(i == 0)
    def _():
        out_ref[...] = jnp.zeros_like(out_ref)

    x = pred_ref[...].astype(jnp.float32)   # logits (native dtype streamed)
    y = true_ref[...].astype(jnp.float32)   # targets

    # Shared transcendental: e = exp(-|x|) feeds both the BCE log-term and
    # sigmoid (via one reciprocal) -> 2 exps + 1 log + 1 recip per element.
    e = jnp.exp(-jnp.abs(x))
    # Exact reciprocal keeps the mean within ~1e-7 of the torch reference.
    # On v7x, approx=True moves this to the near-free EUP vrcp slot at the cost
    # of ~1e-3 relative error in the alpha factor.
    r = pl.reciprocal(1.0 + e, approx=False)
    p = jnp.where(x >= 0.0, r, e * r)                     # sigmoid(x)
    # log1p(e) with a short-series fallback for tiny e (avoids flush-to-zero of
    # log(1+e) for |x| >~ 16.6 while only using Mosaic-supported primitives).
    l1p = jnp.where(e > 1e-4, jnp.log(1.0 + e), e * (1.0 - 0.5 * e))

    # Numerically stable BCE-with-logits (reduction='none'), as in torch:
    #   max(x, 0) - x*y + log1p(exp(-|x|))
    bce = jnp.maximum(x, 0.0) - x * y + l1p
    alpha_factor = 1.0 - jnp.exp((p - y - 1.0) * inv_alpha)
    loss = bce * alpha_factor                             # (tm, LANES)

    def _accum(v):
        # (tm,128) -> (8,128): sublane-aligned tree reduce, pure VPU adds.
        out_ref[...] += v.reshape(tm // 8, 8, LANES).sum(axis=0)

    if mask_tail:
        # Only the globally-last block can contain padded lanes or rows that
        # lie beyond the logical array (stale VMEM from a partial edge DMA).
        is_tail = jnp.logical_and(c == pl.num_programs(0) - 1,
                                  i == pl.num_programs(1) - 1)

        @pl.when(is_tail)
        def _():
            rid = jax.lax.broadcasted_iota(jnp.int32, (tm, LANES), 0)
            lid = jax.lax.broadcasted_iota(jnp.int32, (tm, LANES), 1)
            valid = rid * LANES + lid < n_valid_last      # block-local, no overflow
            _accum(jnp.where(valid, loss, 0.0))

        @pl.when(jnp.logical_not(is_tail))
        def _():
            _accum(loss)
    else:
        _accum(loss)


def bce_blur_with_logits_loss(pred, true, alpha=0.05):
    """Pallas TPU implementation of BCEBlurWithLogitsLoss.forward (f32 scalar)."""
    assert pred.shape == true.shape
    n_elem = int(pred.size)
    assert n_elem > 0
    inv_alpha = 1.0 / (float(alpha) + 1e-4)

    itemsize = jnp.dtype(pred.dtype).itemsize
    sub = max(8, 32 // max(1, itemsize))       # min sublane rows: 8 f32 / 16 bf16 / 32 int8
    ncores = _num_tensorcores()

    rows_exact, tail = divmod(n_elem, LANES)
    pred_f = pred.reshape(-1)
    true_f = true.reshape(-1)

    if tail == 0 and rows_exact >= sub:
        # Zero-copy path: row-major flatten + reshape is free.
        rows = rows_exact
    else:
        # Lane-misaligned (or tiny) inputs: pad flat up to a whole number of
        # sublane tiles, then mask the tail in-kernel.
        # TODO(synk): a fully zero-copy ragged path needs manual DMA from a 1-D
        # pl.ANY ref; with BlockSpec streaming this single pad copy remains.
        rows = max(sub, _round_up(rows_exact + (1 if tail else 0), sub))
        n_pad = rows * LANES - n_elem
        pred_f = jnp.pad(pred_f, (0, n_pad))
        true_f = jnp.pad(true_f, (0, n_pad))

    pred2 = pred_f.reshape(rows, LANES)
    true2 = true_f.reshape(rows, LANES)

    # Tiling: tm rows per block (multiple of `sub`, <= TM_MAX, never larger
    # than the array), chosen so only the globally-last block can be partial
    # (no fully out-of-bounds blocks).
    tm = min(TM_MAX, (rows // sub) * sub)
    blocks = _cdiv(rows, tm)
    if ncores > 1:
        b2 = _round_up(blocks, ncores)
        tm2 = min(tm, _round_up(_cdiv(rows, b2), sub))
        if (b2 - 1) * tm2 < rows:          # keep the core split only if legal
            blocks, tm = b2, tm2
        else:
            ncores = 1
    inner = blocks // ncores

    mask_tail = blocks * tm * LANES > n_elem
    n_valid_last = n_elem - (blocks - 1) * tm * LANES     # static, < tm*128

    kernel = functools.partial(
        _bce_blur_kernel,
        inv_alpha=inv_alpha, tm=tm,
        mask_tail=bool(mask_tail), n_valid_last=int(n_valid_last))

    # TODO(synk): on v7x, verify the leading axis core-shards in the Mosaic
    # dump; switch it to pltpu.CORE_PARALLEL if plain "parallel" does not.
    partials = pl.pallas_call(
        kernel,
        out_shape=jax.ShapeDtypeStruct((ncores * 8, LANES), jnp.float32),
        grid_spec=pltpu.PrefetchScalarGridSpec(
            num_scalar_prefetch=0,
            grid=(ncores, inner),
            in_specs=[
                pl.BlockSpec((tm, LANES), lambda c, i: (c * inner + i, 0)),
                pl.BlockSpec((tm, LANES), lambda c, i: (c * inner + i, 0)),
            ],
            out_specs=pl.BlockSpec((8, LANES), lambda c, i: (c, 0)),
        ),
        compiler_params=pltpu.CompilerParams(
            dimension_semantics=("parallel", "arbitrary"),
            vmem_limit_bytes=VMEM_LIMIT_BYTES),
    )(pred2, true2)

    return jnp.sum(partials) / jnp.float32(n_elem)


def _reference(pred, true, alpha=0.05):
    """Pure-JAX reference mirroring the PyTorch module."""
    x = pred.astype(jnp.float32)
    y = true.astype(jnp.float32)
    loss = jnp.maximum(x, 0.0) - x * y + jnp.log1p(jnp.exp(-jnp.abs(x)))
    p = jax.nn.sigmoid(x)
    alpha_factor = 1.0 - jnp.exp((p - y - 1.0) / (alpha + 1e-4))
    return jnp.mean(loss * alpha_factor)


if __name__ == "__main__":
    key = jax.random.PRNGKey(0)
    k1, k2, k3, k4 = jax.random.split(key, 4)

    # Case 1: detection-head-like shape, 128-aligned -> zero-copy path.
    shape1 = (2, 4, 16, 16)
    pred1 = jax.random.normal(k1, shape1, dtype=jnp.float32) * 2.0
    true1 = (jax.random.uniform(k2, shape1, dtype=jnp.float32) > 0.7).astype(jnp.float32)
    out1 = jax.block_until_ready(bce_blur_with_logits_loss(pred1, true1, alpha=0.05))
    ref1 = _reference(pred1, true1, alpha=0.05)
    assert jnp.allclose(out1, ref1, rtol=1e-4, atol=1e-6), (out1, ref1)

    # Case 2: odd size exercising the padded + gated tail-mask path.
    shape2 = (3, 5, 7, 11)
    pred2 = jax.random.normal(k3, shape2, dtype=jnp.float32) * 2.0
    true2 = jax.random.uniform(k4, shape2, dtype=jnp.float32)
    out2 = jax.block_until_ready(bce_blur_with_logits_loss(pred2, true2, alpha=0.05))
    ref2 = _reference(pred2, true2, alpha=0.05)
    assert jnp.allclose(out2, ref2, rtol=1e-4, atol=1e-6), (out2, ref2)

    # Case 3: bf16 inputs exercising the dtype-aware (16,128) sublane rounding.
    pred3 = (jax.random.normal(k1, shape1, dtype=jnp.float32) * 2.0).astype(jnp.bfloat16)
    true3 = (jax.random.uniform(k2, shape1, dtype=jnp.float32) > 0.7).astype(jnp.bfloat16)
    out3 = jax.block_until_ready(bce_blur_with_logits_loss(pred3, true3, alpha=0.05))
    ref3 = _reference(pred3, true3, alpha=0.05)
    assert jnp.allclose(out3, ref3, rtol=1e-4, atol=1e-6), (out3, ref3)

    print("KERNEL_OK")
</pallas_src>

<mosaic_0001>
module attributes {stable_mosaic.version = 11 : i64} {
  func.func @_bce_blur_kernel(%arg0: i32, %arg1: i32, %arg2: memref<16x128xf32, #tpu.memory_space<vmem>>, %arg3: memref<16x128xf32, #tpu.memory_space<vmem>>, %arg4: memref<8x128xf32, #tpu.memory_space<vmem>>) attributes {dimension_semantics = [#tpu.dimension_semantics<parallel>, #tpu.dimension_semantics<arbitrary>], iteration_bounds = array<i64: 1, 1>, scalar_prefetch = 0 : i64, scratch_operands = 0 : i64, tpu.core_type = #tpu.core_type<tc>, window_params = [{transform_indices = @transform_0, window_bounds = array<i64: 16, 128>}, {transform_indices = @transform_1, window_bounds = array<i64: 16, 128>}, {transform_indices = @transform_2, window_bounds = array<i64: 8, 128>}]} {
    %c0_i32 = arith.constant 0 : i32
    %0 = arith.cmpi eq, %arg1, %c0_i32 : i32
    %1 = arith.extui %0 : i1 to i32
    %c0_i32_0 = arith.constant 0 : i32
    %2 = arith.cmpi ne, %1, %c0_i32_0 : i32
    scf.if %2 {
      %cst_19 = arith.constant 0.000000e+00 : f32
      %46 = vector.broadcast %cst_19 : f32 to vector<8x128xf32>
      %c0_20 = arith.constant 0 : index
      %c0_21 = arith.constant 0 : index
      %47 = vector.load %arg4[%c0_20, %c0_21] : memref<8x128xf32, #tpu.memory_space<vmem>>, vector<8x128xf32>
      tpu.vector_store %arg4[%c0_20, %c0_21], %46 {strides = array<i32>} : memref<8x128xf32, #tpu.memory_space<vmem>>, vector<8x128xf32>,
    } else {
    }
    %c0 = arith.constant 0 : index
    %c0_1 = arith.constant 0 : index
    %3 = vector.load %arg2[%c0, %c0_1] : memref<16x128xf32, #tpu.memory_space<vmem>>, vector<16x128xf32>
    %c0_2 = arith.constant 0 : index
    %c0_3 = arith.constant 0 : index
    %4 = vector.load %arg3[%c0_2, %c0_3] : memref<16x128xf32, #tpu.memory_space<vmem>>, vector<16x128xf32>
    %5 = math.absf %3 : vector<16x128xf32>
    %cst = arith.constant 0.000000e+00 : f32
    %6 = vector.broadcast %cst : f32 to vector<16x128xf32>
    %7 = arith.subf %6, %5 : vector<16x128xf32>
    %8 = math.exp %7 : vector<16x128xf32>
    %cst_4 = arith.constant 1.000000e+00 : f32
    %9 = vector.broadcast %cst_4 : f32 to vector<16x128xf32>
    %10 = arith.addf %9, %8 : vector<16x128xf32>
    %11 = tpu.reciprocal %10 : vector<16x128xf32> -> vector<16x128xf32>
    %cst_5 = arith.constant 0.000000e+00 : f32
    %12 = vector.broadcast %cst_5 : f32 to vector<16x128xf32>
    %13 = arith.cmpf oge, %3, %12 : vector<16x128xf32>
    %14 = arith.mulf %8, %11 : vector<16x128xf32>
    %15 = arith.select %13, %11, %14 : vector<16x128xi1>, vector<16x128xf32>
    %cst_6 = arith.constant 9.99999974E-5 : f32
    %16 = vector.broadcast %cst_6 : f32 to vector<16x128xf32>
    %17 = arith.cmpf ogt, %8, %16 : vector<16x128xf32>
    %cst_7 = arith.constant 1.000000e+00 : f32
    %18 = vector.broadcast %cst_7 : f32 to vector<16x128xf32>
    %19 = arith.addf %18, %8 : vector<16x128xf32>
    %20 = math.log %19 : vector<16x128xf32>
    %cst_8 = arith.constant 5.000000e-01 : f32
    %21 = vector.broadcast %cst_8 : f32 to vector<16x128xf32>
    %22 = arith.mulf %21, %8 : vector<16x128xf32>
    %cst_9 = arith.constant 1.000000e+00 : f32
    %23 = vector.broadcast %cst_9 : f32 to vector<16x128xf32>
    %24 = arith.subf %23, %22 : vector<16x128xf32>
    %25 = arith.mulf %8, %24 : vector<16x128xf32>
    %26 = arith.select %17, %20, %25 : vector<16x128xi1>, vector<16x128xf32>
    %cst_10 = arith.constant 0.000000e+00 : f32
    %27 = vector.broadcast %cst_10 : f32 to vector<16x128xf32>
    %28 = arith.maximumf %3, %27 : vector<16x128xf32>
    %29 = arith.mulf %3, %4 : vector<16x128xf32>
    %30 = arith.subf %28, %29 : vector<16x128xf32>
    %31 = arith.addf %30, %26 : vector<16x128xf32>
    %32 = arith.subf %15, %4 : vector<16x128xf32>
    %cst_11 = arith.constant 1.000000e+00 : f32
    %33 = vector.broadcast %cst_11 : f32 to vector<16x128xf32>
    %34 = arith.subf %32, %33 : vector<16x128xf32>
    %cst_12 = arith.constant 19.9600792 : f32
    %35 = vector.broadcast %cst_12 : f32 to vector<16x128xf32>
    %36 = arith.mulf %34, %35 : vector<16x128xf32>
    %37 = math.exp %36 : vector<16x128xf32>
    %cst_13 = arith.constant 1.000000e+00 : f32
    %38 = vector.broadcast %cst_13 : f32 to vector<16x128xf32>
    %39 = arith.subf %38, %37 : vector<16x128xf32>
    %40 = arith.mulf %31, %39 : vector<16x128xf32>
    %c0_14 = arith.constant 0 : index
    %c0_15 = arith.constant 0 : index
    %41 = vector.load %arg4[%c0_14, %c0_15] : memref<8x128xf32, #tpu.memory_space<vmem>>, vector<8x128xf32>
    %42 = vector.shape_cast %40 : vector<16x128xf32> to vector<2x8x128xf32>
    %cst_16 = arith.constant dense<0.000000e+00> : vector<8x128xf32>
    %43 = vector.multi_reduction <add>, %42, %cst_16 [0] : vector<2x8x128xf32> to vector<8x128xf32>
    %44 = arith.addf %41, %43 : vector<8x128xf32>
    %c0_17 = arith.constant 0 : index
    %c0_18 = arith.constant 0 : index
    %45 = vector.load %arg4[%c0_17, %c0_18] : memref<8x128xf32, #tpu.memory_space<vmem>>, vector<8x128xf32>
    tpu.vector_store %arg4[%c0_17, %c0_18], %44 {strides = array<i32>} : memref<8x128xf32, #tpu.memory_space<vmem>>, vector<8x128xf32>,
    return
  }
  func.func @transform_0(%arg0: i32, %arg1: i32) -> (i32, i32) {
    %c1_i32 = arith.constant 1 : i32
    %0 = arith.muli %arg0, %c1_i32 : i32
    %1 = arith.addi %0, %arg1 : i32
    %c0_i32 = arith.constant 0 : i32
    %c0_i32_0 = arith.constant 0 : i32
    return %1, %c0_i32 : i32, i32
  }
  func.func @transform_1(%arg0: i32, %arg1: i32) -> (i32, i32) {
    %c1_i32 = arith.constant 1 : i32
    %0 = arith.muli %arg0, %c1_i32 : i32
    %1 = arith.addi %0, %arg1 : i32
    %c0_i32 = arith.constant 0 : i32
    %c0_i32_0 = arith.constant 0 : i32
    return %1, %c0_i32 : i32, i32
  }
  func.func @transform_2(%arg0: i32, %arg1: i32) -> (i32, i32) {
    %c0_i32 = arith.constant 0 : i32
    %c0_i32_0 = arith.constant 0 : i32
    return %arg0, %c0_i32 : i32, i32
  }
}

</mosaic_0001>

<bundles_post_ra>
// kernel: tpu_custom_call.1
= control target key start
LH: loop header
LB: loop body
LE: loop exit
PB: predicated region body
PF: predicated region fallthrough
CT: control target
= control target key end

     0   :  { %7 = vsyncpa [#allocation3], 0  ;;  %s324_s0 = inlined_call_operand.hbm [shape: f32[16,128], index: 0, kind: input, shape index: {}]   ;;  %s325_s1 = inlined_call_operand.hbm [shape: f32[16,128], index: 1, kind: input, shape index: {}]   ;;  %s326_s2 = inlined_call_operand.hbm [shape: f32[8,128], index: 2, kind: output, shape index: {}]  }
   0x1   :  { %8 = vsyncpa [#allocation6], 0 }
   0x2   :  { %9 = vsyncpa [#allocation4], 0  ;;  %s18_s11 = sshll.u32 %s324_s0, 4  ;;  %s269_s12 = smov [#allocation2]   ;;  %s19_s11 = int_to_ptr.hbm [resolvable:$true] %s18_s11 }
   0x3   :  { %s20_s13 = sshll.u32 %s269_s12, 4  ;;  %s35_s16 = sshll.u32 %s325_s1, 4  ;;  %s21_s13 = int_to_ptr.vmem [resolvable:$true] %s20_s13  ;;  %s36_s16 = int_to_ptr.hbm [resolvable:$true] %s35_s16 }
   0x4   :  { %s270_s17 = smov 128   ;;  %s271_s18 = smov 8  }
   0x5   :  { %26 = dma.hbm_to_vmem [thread:$0]  %s19_s11, 256, %s21_s13, [#allocation3], %s270_s17, %s270_s17, %s271_s18  }
   0x6   :  { %s272_s19 = smov [#allocation5]  }
   0x7   :  { %s37_s20 = sshll.u32 %s272_s19, 4  ;;  %s38_s20 = int_to_ptr.vmem [resolvable:$true] %s37_s20 }
   0x8   :  { %43 = dma.hbm_to_vmem [thread:$0]  %s36_s16, 256, %s38_s20, [#allocation6], %s270_s17, %s270_s17, %s271_s18  }
   0x9   :  { %263 = dma.done.wait [#allocation3], 256  }
   0xa   :  { %264 = vsyncadd [#allocation3], 4294967040 }
   0xb   :  { %265 = dma.done.wait [#allocation6], 256  }
   0xc   :  { %266 = vsyncadd [#allocation6], 4294967040  ;;  %v295_v0 = vld [vmem:[#allocation2] sm:$0xff]  ;;  %v297_v1 = vld [vmem:[#allocation2 + $0x8] sm:$0xff]  ;;  %s273_s0 = smov [#allocation7]   ;;  %s156_s23 = sshll.u32 %s326_s2, 4  ;;  %s157_s23 = int_to_ptr.hbm [resolvable:$true] %s156_s23 }
   0xd   :  { %v65_v2 = vand.u32 2147483647, %v295_v0  ;;  %v66_v3 = vand.u32 2147483647, %v297_v1  ;;  %vm103_vm8 = vcmp.ge.f32.partialorder %v295_v0, 0.0  ;;  %v63_v31 = vld [vmem:[#allocation5] sm:$0xff] }
   0xe   :  { %vm104_vm9 = vcmp.ge.f32.partialorder %v297_v1, 0.0  ;;  %v64_v34 = vld [vmem:[#allocation5 + $0x8] sm:$0xff]  ;;  %v123_v49 = vmax.f32 %v295_v0, 0.0  ;;  %v124_v50 = vmax.f32 %v297_v1, 0.0  ;;  %v125_v51 = vmul.f32 %v63_v31, %v295_v0  ;;  %s154_s1 = sshll.u32 %s273_s0, 4  ;;  %s155_s1 = int_to_ptr.vmem [resolvable:$true] %s154_s1 }
   0xf   :  { %v67_v4 = vsub.f32 0.0, %v65_v2  ;;  %v68_v5 = vsub.f32 0.0, %v66_v3  ;;  %v126_v55 = vmul.f32 %v64_v34, %v297_v1 }
  0x10   :  { %v127_v60 = vsub.f32 %v123_v49, %v125_v51 }
  0x11   :  { %v69_v6 = vmul.f32 1.442695, %v67_v4  ;;  %v71_v7 = vmul.f32 1.442695, %v68_v5  ;;  %v128_v62 = vsub.f32 %v124_v50, %v126_v55 }
  0x13   :  { %175 = vpow2.f32 %v69_v6 }
  0x14   :  { %177 = vpow2.f32 %v71_v7 }
  0x19   :  { %v301_v8 = vpop.eup %175 }
  0x1a   :  { %v303_v9 = vpop.eup %177  ;;  %v73_v10 = vadd.f32 1.0, %v301_v8  ;;  %v115_v36 = vmul.f32 0.5, %v301_v8  ;;  %vm109_vm10 = vcmp.gt.f32.partialorder %v301_v8, 0.0001 }
  0x1b   :  { %v74_v11 = vadd.f32 1.0, %v303_v9  ;;  %v116_v38 = vmul.f32 0.5, %v303_v9  ;;  %vm110_vm11 = vcmp.gt.f32.partialorder %v303_v9, 0.0001 }
  0x1c   :  { %179 = vrcp.f32 %v73_v10  ;;  %vm80_vm0 = vweird.f32 %v73_v10  ;;  %v86_v15 = vand.u32 2147483648, %v73_v10  ;;  %v84_v18 = vand.u32 2147483647, %v73_v10 }
  0x1d   :  { %181 = vrcp.f32 %v74_v11  ;;  %v100_v19 = vand.u32 2147483648, %v74_v11  ;;  %vm94_vm2 = vweird.f32 %v74_v11  ;;  %v98_v21 = vand.u32 2147483647, %v74_v11 }
  0x1e   :  { %v87_v23 = vor.u32 1.1754944e-38, %v86_v15  ;;  %vm85_vm5 = vcmp.eq.f32.partialorder %v84_v18, 8.507059e+37  ;;  %183 = vlog2.f32 %v73_v10  ;;  %v117_v42 = vsub.f32 1.0, %v115_v36 }
  0x1f   :  { %v101_v26 = vor.u32 1.1754944e-38, %v100_v19  ;;  %vm99_vm7 = vcmp.eq.f32.partialorder %v98_v21, 8.507059e+37  ;;  %185 = vlog2.f32 %v74_v11  ;;  %v118_v45 = vsub.f32 1.0, %v116_v38 }
  0x20   :  { %v119_v54 = vmul.f32 %v301_v8, %v117_v42 }
  0x21   :  { %v120_v58 = vmul.f32 %v303_v9, %v118_v45 }
  0x22   :  { %v180_v12 = vpop.eup %179 }
  0x23   :  { %v182_v13 = vpop.eup %181  ;;  %v76_v14 = vmul.f32 %v180_v12, %v73_v10  ;;  %vm81_vm1 = vweird.f32 %v180_v12 }
  0x24   :  { %v90_v16 = vmul.f32 %v182_v13, %v74_v11  ;;  %vm95_vm3 = vweird.f32 %v182_v13  ;;  %vm82_vm4 = vmor %vm80_vm0, %vm81_vm1  ;;  %v184_v44 = vpop.eup %183 }
  0x25   :  { %v77_v17 = vsub.f32 1.0, %v76_v14  ;;  %vm96_vm6 = vmor %vm94_vm2, %vm95_vm3  ;;  %v186_v47 = vpop.eup %185  ;;  %v112_v53 = vmul.f32 0.6931472, %v184_v44 }
  0x26   :  { %v91_v20 = vsub.f32 1.0, %v90_v16  ;;  %v114_v57 = vmul.f32 0.6931472, %v186_v47 }
  0x27   :  { %v78_v22 = vmul.f32 %v180_v12, %v77_v17  ;;  %v121_v61 = vsel %vm109_vm10, %v112_v53, %v119_v54 }
  0x28   :  { %v92_v24 = vmul.f32 %v182_v13, %v91_v20  ;;  %v122_v63 = vsel %vm110_vm11, %v114_v57, %v120_v58  ;;  %v129_v0 = vadd.f32 %v127_v60, %v121_v61 }
  0x29   :  { %v79_v25 = vadd.f32 %v180_v12, %v78_v22  ;;  %v130_v3 = vadd.f32 %v128_v62, %v122_v63 }
  0x2a   :  { %v93_v27 = vadd.f32 %v182_v13, %v92_v24 }
  0x2b   :  { %v83_v28 = vsel %vm82_vm4, %v180_v12, %v79_v25 }
  0x2c   :  { %v88_v29 = vsel %vm85_vm5, %v87_v23, %v83_v28  ;;  %v97_v30 = vsel %vm96_vm6, %v182_v13, %v93_v27 }
  0x2d   :  { %v102_v32 = vsel %vm99_vm7, %v101_v26, %v97_v30  ;;  %v105_v33 = vmul.f32 %v301_v8, %v88_v29 }
  0x2e   :  { %v106_v35 = vmul.f32 %v303_v9, %v102_v32 }
  0x2f   :  { %v107_v37 = vsel %vm103_vm8, %v88_v29, %v105_v33 }
  0x30   :  { %v108_v39 = vsel %vm104_vm9, %v102_v32, %v106_v35  ;;  %v131_v40 = vsub.f32 %v107_v37, %v63_v31 }
  0x31   :  { %v132_v41 = vsub.f32 %v108_v39, %v64_v34 }
  0x32   :  { %v167_v43 = vadd.f32 -1.0, %v131_v40 }
  0x33   :  { %v168_v46 = vadd.f32 -1.0, %v132_v41 }
  0x34   :  { %v135_v48 = vmul.f32 19.96008, %v167_v43 }
  0x35   :  { %v136_v52 = vmul.f32 19.96008, %v168_v46 }
  0x36   :  { %v137_v56 = vmul.f32 1.442695, %v135_v48 }
  0x37   :  { %v139_v59 = vmul.f32 1.442695, %v136_v52 }
  0x38   :  { %187 = vpow2.f32 %v137_v56 }
  0x39   :  { %189 = vpow2.f32 %v139_v59 }
  0x3e   :  { %v188_v2 = vpop.eup %187 }
  0x3f   :  { %v190_v4 = vpop.eup %189  ;;  %v141_v1 = vsub.f32 1.0, %v188_v2 }
  0x40   :  { %v142_v5 = vsub.f32 1.0, %v190_v4 }
  0x41   :  { %v143_v6 = vmul.f32 %v141_v1, %v129_v0 }
  0x42   :  { %v144_v7 = vmul.f32 %v142_v5, %v130_v3 }
  0x44   :  { %v146_v8 = vadd.f32 %v144_v7, %v143_v6 }
  0x46   :  { %148 = vst [vmem:[#allocation7] sm:$0xff] %v146_v8 }
  0x47   :  { %159 = dma.vmem_to_hbm [thread:$0]  %s155_s1, 128, %s157_s23, [#allocation4]  }
  0x48   :  { %267 = dma.done.wait [#allocation4], 128  }
  0x49   :  { %268 = vsyncadd [#allocation4], 4294967168 }
  0x4a   :  { %164 = vsyncpa [#allocation3], 1 }
  0x4b   :  { %165 = vsyncpa [#allocation6], 1 }
  0x4c   :  { %166 = vsyncpa [#allocation4], 1 }

</bundles_post_ra>
